<compile_context>
chip_gen: v7x
topology: tpu7x:2x2x1
jax: 0.10.0
libtpu: 0.0.40
codegen_flags: <defaults>
</compile_context>

<pallas_src>
import math

import jax
import jax.numpy as jnp
from jax.experimental import pallas as pl
from jax.experimental.pallas import tpu as pltpu


def _round_up(x, m):
    return ((x + m - 1) // m) * m


# ----------------------------------------------------------------------------
# One-time capability probe: does this jax build accept
# pipeline_mode=pl.Buffered(1) on a grid-invariant BlockSpec?
# ----------------------------------------------------------------------------
def _probe_buffered():
    if not hasattr(pl, "Buffered"):
        return False

    def _copy(x_ref, o_ref):
        o_ref[...] = x_ref[...]

    try:
        fn = pl.pallas_call(
            _copy,
            out_shape=jax.ShapeDtypeStruct((8, 128), jnp.float32),
            grid=(2,),
            in_specs=[pl.BlockSpec((8, 128), lambda i: (0, 0),
                                   pipeline_mode=pl.Buffered(1))],
            out_specs=pl.BlockSpec((8, 128), lambda i: (0, 0)),
        )
        jax.jit(fn).lower(
            jax.ShapeDtypeStruct((8, 128), jnp.float32)).compile()
        return True
    except Exception:  # capability probe only; real kernels never hide errors
        return False


_HAS_BUFFERED = _probe_buffered()


# ----------------------------------------------------------------------------
# Kernels
# ----------------------------------------------------------------------------
def _ffn_resident_kernel(x_ref, w1t_ref, b1_ref, w2t_ref, b2_ref, o_ref):
    # x_ref: (tm, dim)  w1t_ref: (dim, hidden)  b1_ref: (1, hidden)
    # w2t_ref: (hidden, dim)  b2_ref: (1, dim)  o_ref: (tm, dim)
    x = x_ref[...]
    h = jnp.dot(x, w1t_ref[...], preferred_element_type=jnp.float32)
    h = h + b1_ref[...]
    h = h * jax.nn.sigmoid(h)                    # SiLU in f32
    # Dropout(p=0.0) is identity -> no-op.
    out = jnp.dot(h.astype(x.dtype), w2t_ref[...],
                  preferred_element_type=jnp.float32)
    o_ref[...] = (out + b2_ref[...]).astype(o_ref.dtype)


def _ffn_streamed_kernel(x_ref, w1t_ref, b1_ref, w2t_ref, b2_ref, o_ref,
                         acc_ref):
    # Hidden dimension streamed along grid axis 1 ("arbitrary" reduction axis),
    # accumulated into an f32 VMEM scratch resident across that axis.
    j = pl.program_id(1)

    @pl.when(j == 0)
    def _():
        acc_ref[...] = jnp.zeros_like(acc_ref)

    x = x_ref[...]
    h = jnp.dot(x, w1t_ref[...], preferred_element_type=jnp.float32)
    h = h + b1_ref[...]
    h = h * jax.nn.sigmoid(h)                    # SiLU in f32
    # Dropout(p=0.0) is identity -> no-op.
    acc_ref[...] += jnp.dot(h.astype(x.dtype), w2t_ref[...],
                            preferred_element_type=jnp.float32)

    @pl.when(j == pl.num_programs(1) - 1)
    def _():
        # b2 added exactly once, in the epilogue.
        o_ref[...] = (acc_ref[...] + b2_ref[...]).astype(o_ref.dtype)


# ----------------------------------------------------------------------------
# Tile / mode selection (generation-aware VMEM budget)
# ----------------------------------------------------------------------------
def _choose_config(M, dim, hidden, itemsize):
    try:
        vmem_cap = pltpu.get_tpu_info().vmem_capacity_bytes
    except Exception:  # conservative (v7x-sized) fallback if query unavailable
        vmem_cap = 64 * 1024 * 1024
    budget = int(vmem_cap * 0.75)       # ~96 MiB on v5e/v6e, ~48 MiB on v7x
    vmem_limit = int(vmem_cap * 0.85)   # headroom for Mosaic internal scratch

    # Token-tile cap: full extent, >=2 blocks when possible (megacore sharding
    # on v7x), never above 1024 rows (>=512 already reaches ~85% of roofline).
    tm_cap = _round_up(M, 8)
    if M >= 16:
        tm_cap = min(tm_cap, _round_up(-(-M // 2), 8))
    tm_cap = min(tm_cap, 1024)
    tm_cands = sorted({tm_cap} | {c for c in (1024, 512, 256, 128, 64, 32, 16, 8)
                                  if c <= tm_cap}, reverse=True)

    wbuf = 1 if _HAS_BUFFERED else 2    # buffering factor for resident weights

    def resident_fp(tm_):
        weights = wbuf * 2 * dim * hidden * itemsize         # W1t + W2t
        biases = wbuf * (hidden + dim) * itemsize
        io = 2 * tm_ * dim * itemsize * 2                     # x + out, 2-buf
        inter = tm_ * hidden * (4 + itemsize)                 # f32 h + cast copy
        return weights + biases + io + inter

    for tm_ in tm_cands:
        if resident_fp(tm_) <= budget:
            return "resident", tm_, hidden, vmem_limit

    # Streamed path: hidden tiled along an "arbitrary" reduction axis.
    # Prefer 256-multiples (2x256^2 MXU on v6e/v7x); 128 only when forced.
    th_cands = [c for c in (2048, 1024, 512, 256) if hidden % c == 0]
    if hidden % 128 == 0:
        th_cands.append(128)
    if not th_cands:
        th_cands = [hidden]

    def streamed_fp(tm_, th_):
        weights = 2 * 2 * dim * th_ * itemsize                # W1t/W2t slabs
        biases = 2 * th_ * itemsize + wbuf * dim * itemsize
        io = 2 * tm_ * dim * itemsize * 2
        acc = tm_ * dim * 4
        inter = tm_ * th_ * (4 + itemsize)
        return weights + biases + io + acc + inter

    for tm_ in tm_cands:                # maximize tm first (halves weight HBM
        for th_ in th_cands:            # re-streaming), then shrink th to fit
            if streamed_fp(tm_, th_) <= budget:
                return "streamed", tm_, th_, vmem_limit
    return "streamed", tm_cands[-1], th_cands[-1], vmem_limit


# ----------------------------------------------------------------------------
# Wrapper
# ----------------------------------------------------------------------------
def _feed_forward_impl(x, w1, b1, w2, b2):
    """Fused FeedForward.

    x:  (..., dim)
    w1: (hidden, dim), b1: (hidden,)  -- PyTorch nn.Linear(dim, hidden) params
    w2: (dim, hidden), b2: (dim,)     -- PyTorch nn.Linear(hidden, dim) params
    """
    orig_shape = x.shape
    dim = orig_shape[-1]
    hidden = w1.shape[0]
    M = int(math.prod(orig_shape[:-1]))

    mode, tm, th, vmem_limit = _choose_config(M, dim, hidden, x.dtype.itemsize)

    x2d = x.reshape(M, dim)
    # One-time transpose (fused by XLA under jit) so both in-kernel matmuls are
    # plain NN contractions -- no per-tile XLU transpose in the hot loop.
    w1t = w1.T                              # (dim, hidden)
    w2t = w2.T                              # (hidden, dim)
    b1_2d = b1.reshape(1, hidden)
    b2_2d = b2.reshape(1, dim)

    num_m = pl.cdiv(M, tm)                  # ragged last block masked by Pallas
    inv = dict(pipeline_mode=pl.Buffered(1)) if _HAS_BUFFERED else {}

    if mode == "resident":
        grid_spec = pltpu.PrefetchScalarGridSpec(
            num_scalar_prefetch=0,
            grid=(num_m,),
            in_specs=[
                pl.BlockSpec((tm, dim), lambda i: (i, 0)),              # x rows
                pl.BlockSpec((dim, hidden), lambda i: (0, 0), **inv),   # W1^T
                pl.BlockSpec((1, hidden), lambda i: (0, 0), **inv),     # b1
                pl.BlockSpec((hidden, dim), lambda i: (0, 0), **inv),   # W2^T
                pl.BlockSpec((1, dim), lambda i: (0, 0), **inv),        # b2
            ],
            out_specs=pl.BlockSpec((tm, dim), lambda i: (i, 0)),
        )
        kernel = _ffn_resident_kernel
        dims = ("parallel",)
    else:
        grid_spec = pltpu.PrefetchScalarGridSpec(
            num_scalar_prefetch=0,
            grid=(num_m, hidden // th),     # reduction axis last
            in_specs=[
                pl.BlockSpec((tm, dim), lambda i, j: (i, 0)),           # x rows
                pl.BlockSpec((dim, th), lambda i, j: (0, j)),           # W1^T
                pl.BlockSpec((1, th), lambda i, j: (0, j)),             # b1
                pl.BlockSpec((th, dim), lambda i, j: (j, 0)),           # W2^T
                pl.BlockSpec((1, dim), lambda i, j: (0, 0), **inv),     # b2
            ],
            out_specs=pl.BlockSpec((tm, dim), lambda i, j: (i, 0)),
            scratch_shapes=[pltpu.VMEM((tm, dim), jnp.float32)],
        )
        kernel = _ffn_streamed_kernel
        dims = ("parallel", "arbitrary")

    out2d = pl.pallas_call(
        kernel,
        out_shape=jax.ShapeDtypeStruct((M, dim), x.dtype),
        grid_spec=grid_spec,
        compiler_params=pltpu.CompilerParams(
            dimension_semantics=dims,
            vmem_limit_bytes=vmem_limit,
        ),
    )(x2d, w1t, b1_2d, w2t, b2_2d)

    return out2d.reshape(orig_shape)


feed_forward = jax.jit(_feed_forward_impl)


def _reference(x, w1, b1, w2, b2):
    h = jnp.einsum("bnd,hd->bnh", x, w1) + b1
    h = h * jax.nn.sigmoid(h)
    return jnp.einsum("bnh,dh->bnd", h, w2) + b2


if __name__ == "__main__":
    # Small shapes consistent with the module's token-wise MLP forward.
    # (Production dims would be multiples of 128 for lane-dense stores.)
    batch, seq, dim, hidden_dim = 2, 8, 32, 64

    key = jax.random.PRNGKey(0)
    kx, kw1, kb1, kw2, kb2 = jax.random.split(key, 5)

    x = jax.random.normal(kx, (batch, seq, dim), dtype=jnp.float32)
    # PyTorch nn.Linear parameter shapes: (out_features, in_features).
    w1 = jax.random.normal(kw1, (hidden_dim, dim), dtype=jnp.float32) * 0.05
    b1 = jax.random.normal(kb1, (hidden_dim,), dtype=jnp.float32) * 0.05
    w2 = jax.random.normal(kw2, (dim, hidden_dim), dtype=jnp.float32) * 0.05
    b2 = jax.random.normal(kb2, (dim,), dtype=jnp.float32) * 0.05

    out = feed_forward(x, w1, b1, w2, b2)
    out = jax.block_until_ready(out)

    ref = _reference(x, w1, b1, w2, b2)
    assert out.shape == (batch, seq, dim)
    assert jnp.allclose(out, ref, atol=1e-5, rtol=1e-5), "mismatch vs reference"

    print("KERNEL_OK")
</pallas_src>

<mosaic_0001>
module attributes {stable_mosaic.version = 11 : i64} {
  func.func @_ffn_resident_kernel(%arg0: i32, %arg1: memref<8x32xf32, #tpu.memory_space<vmem>>, %arg2: memref<32x64xf32, #tpu.memory_space<vmem>>, %arg3: memref<1x64xf32, #tpu.memory_space<vmem>>, %arg4: memref<64x32xf32, #tpu.memory_space<vmem>>, %arg5: memref<1x32xf32, #tpu.memory_space<vmem>>, %arg6: memref<8x32xf32, #tpu.memory_space<vmem>>) attributes {dimension_semantics = [#tpu.dimension_semantics<parallel>], iteration_bounds = array<i64: 2>, scalar_prefetch = 0 : i64, scratch_operands = 0 : i64, tpu.core_type = #tpu.core_type<tc>, window_params = [{transform_indices = @transform_0, window_bounds = array<i64: 8, 32>}, {pipeline_mode = #tpu.pipeline_mode<synchronous>, transform_indices = @transform_1, window_bounds = array<i64: 32, 64>}, {pipeline_mode = #tpu.pipeline_mode<synchronous>, transform_indices = @transform_2, window_bounds = array<i64: 1, 64>}, {pipeline_mode = #tpu.pipeline_mode<synchronous>, transform_indices = @transform_3, window_bounds = array<i64: 64, 32>}, {pipeline_mode = #tpu.pipeline_mode<synchronous>, transform_indices = @transform_4, window_bounds = array<i64: 1, 32>}, {transform_indices = @transform_5, window_bounds = array<i64: 8, 32>}]} {
    %c0 = arith.constant 0 : index
    %c0_0 = arith.constant 0 : index
    %0 = vector.load %arg1[%c0, %c0_0] : memref<8x32xf32, #tpu.memory_space<vmem>>, vector<8x32xf32>
    %c0_1 = arith.constant 0 : index
    %c0_2 = arith.constant 0 : index
    %1 = vector.load %arg2[%c0_1, %c0_2] : memref<32x64xf32, #tpu.memory_space<vmem>>, vector<32x64xf32>
    %cst = arith.constant dense<0.000000e+00> : vector<8x64xf32>
    %2 = tpu.matmul %0, %1, %cst {dimension_numbers = #tpu.dot_dimension_numbers<[1], [0], [0], [1], [0, 0, 1, 1], [], []>} : vector<8x32xf32>, vector<32x64xf32>, vector<8x64xf32> -> vector<8x64xf32>
    %c0_3 = arith.constant 0 : index
    %c0_4 = arith.constant 0 : index
    %3 = vector.load %arg3[%c0_3, %c0_4] : memref<1x64xf32, #tpu.memory_space<vmem>>, vector<1x64xf32>
    %4 = vector.broadcast %3 : vector<1x64xf32> to vector<8x64xf32>
    %5 = arith.addf %2, %4 : vector<8x64xf32>
    %6 = arith.negf %5 : vector<8x64xf32>
    %7 = math.exp %6 : vector<8x64xf32>
    %cst_5 = arith.constant 1.000000e+00 : f32
    %8 = vector.broadcast %cst_5 : f32 to vector<8x64xf32>
    %9 = arith.addf %8, %7 : vector<8x64xf32>
    %10 = arith.divf %8, %9 : vector<8x64xf32>
    %11 = arith.mulf %5, %10 : vector<8x64xf32>
    %c0_6 = arith.constant 0 : index
    %c0_7 = arith.constant 0 : index
    %12 = vector.load %arg4[%c0_6, %c0_7] : memref<64x32xf32, #tpu.memory_space<vmem>>, vector<64x32xf32>
    %cst_8 = arith.constant dense<0.000000e+00> : vector<8x32xf32>
    %13 = tpu.matmul %11, %12, %cst_8 {dimension_numbers = #tpu.dot_dimension_numbers<[1], [0], [0], [1], [0, 0, 1, 1], [], []>} : vector<8x64xf32>, vector<64x32xf32>, vector<8x32xf32> -> vector<8x32xf32>
    %c0_9 = arith.constant 0 : index
    %c0_10 = arith.constant 0 : index
    %14 = vector.load %arg5[%c0_9, %c0_10] : memref<1x32xf32, #tpu.memory_space<vmem>>, vector<1x32xf32>
    %15 = vector.broadcast %14 : vector<1x32xf32> to vector<8x32xf32>
    %16 = arith.addf %13, %15 : vector<8x32xf32>
    %c0_11 = arith.constant 0 : index
    %c0_12 = arith.constant 0 : index
    %17 = vector.load %arg6[%c0_11, %c0_12] : memref<8x32xf32, #tpu.memory_space<vmem>>, vector<8x32xf32>
    tpu.vector_store %arg6[%c0_11, %c0_12], %16 {strides = array<i32>} : memref<8x32xf32, #tpu.memory_space<vmem>>, vector<8x32xf32>,
    return
  }
  func.func @transform_0(%arg0: i32) -> (i32, i32) {
    %c0_i32 = arith.constant 0 : i32
    %c0_i32_0 = arith.constant 0 : i32
    return %arg0, %c0_i32 : i32, i32
  }
  func.func @transform_1(%arg0: i32) -> (i32, i32) {
    %c0_i32 = arith.constant 0 : i32
    %c0_i32_0 = arith.constant 0 : i32
    %c0_i32_1 = arith.constant 0 : i32
    return %c0_i32, %c0_i32_0 : i32, i32
  }
  func.func @transform_2(%arg0: i32) -> (i32, i32) {
    %c0_i32 = arith.constant 0 : i32
    %c0_i32_0 = arith.constant 0 : i32
    %c0_i32_1 = arith.constant 0 : i32
    return %c0_i32, %c0_i32_0 : i32, i32
  }
  func.func @transform_3(%arg0: i32) -> (i32, i32) {
    %c0_i32 = arith.constant 0 : i32
    %c0_i32_0 = arith.constant 0 : i32
    %c0_i32_1 = arith.constant 0 : i32
    return %c0_i32, %c0_i32_0 : i32, i32
  }
  func.func @transform_4(%arg0: i32) -> (i32, i32) {
    %c0_i32 = arith.constant 0 : i32
    %c0_i32_0 = arith.constant 0 : i32
    %c0_i32_1 = arith.constant 0 : i32
    return %c0_i32, %c0_i32_0 : i32, i32
  }
  func.func @transform_5(%arg0: i32) -> (i32, i32) {
    %c0_i32 = arith.constant 0 : i32
    %c0_i32_0 = arith.constant 0 : i32
    return %arg0, %c0_i32 : i32, i32
  }
}

</mosaic_0001>

<bundles_post_ra>
// kernel: _feed_forward_impl.1
= control target key start
LH: loop header
LB: loop body
LE: loop exit
PB: predicated region body
PF: predicated region fallthrough
CT: control target
= control target key end

     0   :  { %10 = vsyncpa [#allocation3], 0  ;;  %s841_s0 = inlined_call_operand.vmem [shape: f32[16,32], index: 0, kind: input, shape index: {}]   ;;  %s842_s1 = inlined_call_operand.vmem [shape: f32[32,64], index: 1, kind: input, shape index: {}]   ;;  %s843_s2 = inlined_call_operand.vmem [shape: f32[1,64], index: 2, kind: input, shape index: {}]   ;;  %s844_s3 = inlined_call_operand.vmem [shape: f32[64,32], index: 3, kind: input, shape index: {}]   ;;  %s845_s4 = inlined_call_operand.vmem [shape: f32[1,32], index: 4, kind: input, shape index: {}]   ;;  %s846_s5 = inlined_call_operand.hbm [shape: f32[16,32], index: 5, kind: output, shape index: {}]  }
   0x1   :  { %12 = vsyncpa [#allocation3 + $0x1], 0  ;;  %s697_s18 = smov 0   ;;  %s699_s19 = smov 0  }
   0x2   :  { %s701_s20 = smov 0   ;;  %s703_s21 = smov 0  }
   0x3 LB: > { %s718_s22 = sadd.s32 4294967295, %s661_s21   ;;  %s476_s23 = sadd.s32 4294967294, %s661_s21   ;;  %s661_s21 = sphi %s703_s21, %s852_s21   ;;  %s657_s20 = sphi %s701_s20, %s851_s20   ;;  %s653_s19 = sphi %s699_s19, %s850_s19   ;;  %s649_s18 = sphi %s697_s18, %s849_s18  }
   0x4   : > { %s722_s24 = sadd.s32 1, %s661_s21   ;;  %s135_s25 = sadd.s32 1, %s657_s20 }
   0x5   : > { %s132_s26 = ssub.s32 %s661_s21, %s722_s24  ;;  %p145_p0 = scmp.ne.s32.totalorder %s657_s20, %s653_s19 }
   0x6   : > { %p133_p1 = scmp.eq.s32.totalorder %s132_s26, 0  ;;  %p146_p2 = scmp.eq.s32.totalorder %s718_s22, 1 }
   0x7   : > { %p151_p3 = scmp.ne.s32.totalorder %s653_s19, %s649_s18  ;;  %p152_p4 = scmp.eq.s32.totalorder %s476_s23, 1 }
   0x8   : > { %s733_s27 = scalar_select %p133_p1, %s657_s20, %s135_s25  }
   0x9   : > { %p735_p5 = por %p146_p2, %p145_p0  ;;  %p739_p6 = por %p152_p4, %p151_p3 }
   0xa   : > { %p479_p7 = scmp.ge.s32.totalorder %s661_s21, 1  ;;  %p189_p8 = scmp.lt.s32.totalorder %s661_s21, 3 }
   0xc   : > { %p190_p9 = pnand %p479_p7, %p189_p8 }
   0xd   : > { %v221_v0 = vld [vmem:[%s842_s1] sm:$0xff] (!%p190_p9)  ;;  %v222_v1 = vld [vmem:[%s842_s1 + $0x8] sm:$0xff] (!%p190_p9)  ;;  %v223_v2 = vld [vmem:[%s842_s1 + $0x10] sm:$0xff] (!%p190_p9)  ;;  %v663_v3 = vmov (!%p190_p9), 0.0|0.0   ;;  %vm664_vm0 = vmmov (!%p190_p9), 0   ;;  %v665_v6 = vmov (!%p190_p9), 0.0  }
   0xe   : > { %193 = sbr.rel (%p190_p9) target bundleno = 496 (0x1f0), region = 40  ;;  %535 = vmatprep.subr.bf16.mxu0 (!%p190_p9), %v663_v3  ;;  %v536_v4 = vpack.c.bf16 (!%p190_p9), %v222_v1, %v221_v0  ;;  %v224_v5 = vld [vmem:[%s842_s1 + $0x18] sm:$0xff] (!%p190_p9)  ;;  %513 = vmatprep.mubr.msk.f32.mxu0 (!%p190_p9), %vm664_vm0, %v665_v6  ;;  %p216_p10 = scmp.lt.s32.totalorder (!%p190_p9), %s718_s22, 1  ;;  %vm232_vm1 = vcmask (!%p190_p9), 261120   ;;  %v313_v9 = vld [vmem:[%s844_s3] sm:$0xff] (!%p190_p9)  ;;  %v314_v10 = vld [vmem:[%s844_s3 + $0x8] sm:$0xff] (!%p190_p9) }
   0xf   : > { %541 = vmatprep.subr.bf16.mxu1 (!%p190_p9), %v663_v3  ;;  %532 = vmatprep.mubr.msk.f32.mxu1 (!%p190_p9), %vm664_vm0, %v665_v6  ;;  %v539_v7 = vpack.c.bf16 (!%p190_p9), %v224_v5, %v223_v2  ;;  %v542_v11 = vpack.c.bf16 (!%p190_p9), %v314_v10, %v313_v9  ;;  %v315_v12 = vld [vmem:[%s844_s3 + $0x10] sm:$0xff] (!%p190_p9)  ;;  %v316_v13 = vld [vmem:[%s844_s3 + $0x18] sm:$0xff] (!%p190_p9)  ;;  %v317_v15 = vld [vmem:[%s844_s3 + $0x20] sm:$0xff] (!%p190_p9)  ;;  %vm328_vm2 = vcmask (!%p190_p9), 523264   ;;  %s213_s26 = sand.u32 (!%p190_p9), 1, %s653_s19   ;;  %s488_s8 = sshll.u32 (!%p190_p9), %s718_s22, 7 }
  0x10   : > { %537 = vmatpush3.bf16.msra.mxu0 (!%p190_p9), %v536_v4  ;;  %v545_v14 = vpack.c.bf16 (!%p190_p9), %v316_v13, %v315_v12  ;;  %v318_v16 = vld [vmem:[%s844_s3 + $0x28] sm:$0xff] (!%p190_p9)  ;;  %v319_v18 = vld [vmem:[%s844_s3 + $0x30] sm:$0xff] (!%p190_p9)  ;;  %v320_v19 = vld [vmem:[%s844_s3 + $0x38] sm:$0xff] (!%p190_p9)  ;;  %s480_s30 = sshll.u32 (!%p190_p9), %s213_s26, 3 }
  0x11   : > { %538 = vmatprep.subr.bf16.mxu0 (!%p190_p9), %v663_v3  ;;  %543 = vmatpush3.bf16.msra.mxu1 (!%p190_p9), %v542_v11  ;;  %v548_v17 = vpack.c.bf16 (!%p190_p9), %v318_v16, %v317_v15  ;;  %v551_v20 = vpack.c.bf16 (!%p190_p9), %v320_v19, %v319_v18  ;;  %v482_v21 = vld [vmem:[%s843_s2] ss:$0 sm:$0xff] (!%p190_p9)  ;;  %s215_s9 = scalar_lea.vmem (!%p190_p9), [#allocation2], %s480_s30 }
  0x12   : > { %544 = vmatprep.subr.bf16.mxu1 (!%p190_p9), %v663_v3  ;;  %v485_v30 = vld [vmem:[%s845_s4] ss:$0 sm:$0xff] (!%p190_p9)  ;;  %s417_s10 = sshll.u32 (!%p190_p9), %s215_s9, 4  ;;  %s800_s10 = int_to_ptr.vmem [resolvable:$true] %s417_s10 }
  0x13   : > { %s599_s15 = scalar_lea.vmem (!%p190_p9), %s800_s10, 128 }
  0x14   : > { %540 = vmatpush3.bf16.msra.mxu0 (!%p190_p9), %v539_v7  ;;  %p600_p11 = scmp.ne.s32.totalorder (!%p190_p9), %s800_s10, %s599_s15 }
  0x15   : > { %s217_s13 = scalar_select %p216_p10, %s718_s22, 1  ;;  %546 = vmatpush3.bf16.msra.mxu1 %v545_v14 }
  0x16   : > { %547 = vmatprep.subr.bf16.mxu1 %v663_v3  ;;  %p601_p12 = pnand %p600_p11, %p735_p5  ;;  %s666_s22 = smov [#allocation2]  }
  0x17   : > { %s481_s14 = sshll.u32 %s217_s13, 3  ;;  %s798_s13 = scalar_lea.hbm %s846_s5, %s488_s8 }
  0x18   : > { %s219_s17 = scalar_lea.vmem %s841_s0, %s481_s14  ;;  %s404_s14 = scalar_lea.sflag [#allocation3], %s213_s26 }
  0x19   : > { %v220_v8 = vld [vmem:[%s219_s17] sm:$0xff]  ;;  %549 = vmatpush3.bf16.msra.mxu1 %v548_v17  ;;  %p602_p13 = pneg %p601_p12  ;;  %s603_s16 = sshll.u32 %s666_s22, 4  ;;  %s604_s16 = int_to_ptr.vmem [resolvable:$false] %s603_s16 }
  0x1a   : > { %514 = vmatmul.mubr.msk.f32.vlgmr.msra.gmra.mrb[0].mxu0 %vm232_vm1, %v220_v8  ;;  %550 = vmatprep.subr.bf16.mxu1 %v663_v3  ;;  %s605_s17 = scalar_lea.vmem %s604_s16, 256  ;;  %p606_p0 = scmp.lt.s32.totalorder %s800_s10, %s604_s16 }
  0x1b   : > { %p607_p1 = scmp.lt.s32.totalorder %s605_s17, %s599_s15 }
  0x1d   : > { %552 = vmatpush3.bf16.msra.mxu1 %v551_v20  ;;  %p608_p2 = por %p607_p1, %p606_p0 }
  0x1f   : > { %p609_p3 = pnand %p608_p2, %p602_p13 }
  0xed   : > { %v302_v22 = vpop.f32.mrb[0].mxu0 }
  0xee   : > { %v303_v23 = vadd.f32 %v482_v21, %v302_v22  ;;  %v515_v24 = vpop.f32.mrb[1].mxu0 }
  0xf0   : > { %v484_v25 = vmul.f32 -1.442695, %v303_v23 }
  0xf2   : > { %595 = vpow2.f32 %v484_v25 }
  0xfc   : > { %v596_v26 = vpop.eup %595 }
  0xfd   : > { %v309_v27 = vadd.f32 1.0, %v596_v26 }
  0xff   : > { %597 = vrcp.f32 %v309_v27 }
 0x109   : > { %v598_v28 = vpop.eup %597 }
 0x10a   : > { %v312_v29 = vmul.f32 %v598_v28, %v303_v23 }
 0x10c   : > { %533 = vmatmul.mubr.msk.f32.vlgmr.msra.gmra.mrb[0].mxu1 %vm328_vm2, %v312_v29 }
 0x1df   : > { %v398_v31 = vpop.f32.mrb[0].mxu1 }
 0x1e0   : > { %v399_v32 = vadd.f32 %v485_v30, %v398_v31  ;;  %v534_v33 = vpop.f32.mrb[1].mxu1 }
 0x1e2   : > { %402 = vst.msk [vmem:[%s215_s9] sm:$0xff] %vm232_vm1, %v399_v32 }
 0x1e3   : > { %612 = shalt.err (!%p609_p3)
}
 0x1e4   : > { %s613_s23 = scalar_lea.hbm %s798_s13, 128  ;;  %s617_s30 = scalar_lea.hbm %s846_s5, 256 }
 0x1e5   : > { %p614_p4 = scmp.ne.s32.totalorder %s798_s13, %s613_s23  ;;  %p618_p9 = scmp.lt.u32.totalorder %s798_s13, %s846_s5 }
 0x1e6   : > { %p619_p10 = scmp.lt.u32.totalorder %s617_s30, %s613_s23  ;;  %p621_p12 = scmp.lt.u32.totalorder %s613_s23, %s798_s13 }
 0x1e7   : > { %p615_p7 = pnand %p614_p4, %p735_p5 }
 0x1e8   : > { %p620_p11 = por %p619_p10, %p618_p9 }
 0x1e9   : > { %p616_p8 = pneg %p615_p7 }
 0x1ea   : > { %p622_p13 = por %p621_p12, %p620_p11 }
 0x1ec   : > { %p623_p0 = pnand %p622_p13, %p616_p8 }
 0x1ee   : > { %626 = shalt.err (!%p623_p0)
}
 0x1ef   : > { %553 = dma.vmem_to_hbm [thread:$0]  (%p735_p5), %s800_s10, 128, %s798_s13, %s404_s14  }
 0x1f0 PF: > { %p559_p1 = scmp.ge.s32.totalorder %s661_s21, 2  ;;  %s429_s8 = sand.u32 1, %s649_s18  }
 0x1f1   : > { %s430_s9 = scalar_lea.sflag [#allocation3], %s429_s8 }
 0x1f2   : > { %p556_p2 = pnand %p559_p1, %p739_p6 }
 0x1f4   : > { %644 = dma.done.wait (!%p556_p2), %s430_s9, 128  }
 0x1f5   : > { %646 = vsyncadd (!%p556_p2), %s430_s9, 4294967168  ;;  %p15_p3 = scmp.ge.s32.totalorder %s722_s24, 4   ;;  %s849_s18 = smov %s653_s19 }
 0x1f6   : > { %s850_s19 = smov %s657_s20  ;;  %s851_s20 = smov %s733_s27 }
 0x1f7   : > { %s852_s21 = smov %s722_s24  ;;  %17 = sbr.rel (!%p15_p3) target bundleno = 3 (0x3), region = 75 }
 0x1fe   :  { %435 = vsyncpa [#allocation3], 1 }
 0x1ff   :  { %437 = vsyncpa [#allocation3 + $0x1], 1 }

</bundles_post_ra>
